<compile_context>
chip_gen: v7x
topology: tpu7x:2x2x1
jax: 0.10.0
libtpu: 0.0.40
codegen_flags: <defaults>
</compile_context>

<pallas_src>
import jax
import jax.numpy as jnp
from jax.experimental import pallas as pl
from jax.experimental.pallas import tpu as pltpu

NUM_INPUTS = 784    # 1 * 28 * 28
NUM_OUTPUTS = 10

LANE = 128
SUBLANE = 8

# f32 x rows double-buffered: 2 * (784*4 + 10*4) B/row * 4096 rows ~= 26 MiB,
# well inside the 48 MiB vmem_limit_bytes on v5e/v6e/v7x.
TB_MAX = 4096
VMEM_LIMIT_BYTES = 48 * 1024 * 1024


def linear_kernel(x_ref, w_ref, b_ref, o_ref):
    # x: (TB, K) f32 straight from HBM; cast to bf16 on the VPU (free — the
    # kernel is DMA-bound), then one MXU pass against the 128-lane-padded
    # bf16 weight with f32 accumulation.
    x_bf = x_ref[...].astype(jnp.bfloat16)
    acc = jnp.dot(x_bf, w_ref[...], preferred_element_type=jnp.float32)   # (TB, Np)
    # Slice the f32 accumulator (not the weight) down to the narrow N lanes,
    # add f32 bias, store the narrow (TB, N) output block.
    n = o_ref.shape[-1]
    o_ref[...] = (acc[:, :n] + b_ref[...]).astype(o_ref.dtype)


def _pick_batch_tile(batch):
    """Largest tile within the VMEM budget, kept to a sublane multiple, and
    capped at ceil(B/2) so the grid has >=2 steps whenever B allows it
    (lets 'parallel' actually shard the batch across v7x's 2 TensorCores)."""
    half = pl.cdiv(batch, 2)
    half = pl.cdiv(half, SUBLANE) * SUBLANE
    return min(TB_MAX, max(SUBLANE, half))


def linear_net_forward(x_nchw, weight_nk, bias_n):
    """x_nchw: (B, C, H, W) f32; weight_nk: (N, K) PyTorch layout; bias_n: (N,)."""
    B = x_nchw.shape[0]
    N, K = weight_nk.shape

    # Glue: flatten NCHW -> (B, K), same as torch's x.view(x.shape[0], -1).
    # No dtype cast, no batch pad: x streams into the kernel as-is.
    x2d = x_nchw.reshape(B, K)

    # Weight: transpose to (K, N), bf16 for the MXU, pad lanes to 128 so the
    # rhs is not a degenerate 10-wide MXU pass.  Tiny (≈200 KiB), VMEM-resident.
    Np = max(LANE, pl.cdiv(N, LANE) * LANE)
    w_kn = jnp.transpose(weight_nk).astype(jnp.bfloat16)
    w_pad = jnp.zeros((K, Np), jnp.bfloat16).at[:, :N].set(w_kn)

    # Bias stays narrow f32 (block == full array, legal).
    b2d = bias_n.astype(jnp.float32).reshape(1, N)

    TB = _pick_batch_tile(B)
    grid = (pl.cdiv(B, TB),)

    out = pl.pallas_call(
        linear_kernel,
        out_shape=jax.ShapeDtypeStruct((B, N), jnp.float32),   # narrow output, no post-slice
        grid=grid,
        in_specs=[
            pl.BlockSpec((TB, K), lambda i: (i, 0)),    # x: streamed f32 per batch tile
            pl.BlockSpec((K, Np), lambda i: (0, 0)),    # W: VMEM-resident, 128-lane padded
            pl.BlockSpec((1, N), lambda i: (0, 0)),     # bias: VMEM-resident, narrow
        ],
        out_specs=pl.BlockSpec((TB, N), lambda i: (i, 0)),
        compiler_params=pltpu.CompilerParams(
            dimension_semantics=("parallel",),           # megacore-shardable on v7x
            vmem_limit_bytes=VMEM_LIMIT_BYTES,           # headroom over 16/32 MiB scoped defaults
        ),
    )(x2d, w_pad, b2d)

    return out


if __name__ == "__main__":
    key = jax.random.PRNGKey(0)
    k_x, k_w, k_b = jax.random.split(key, 3)

    # Fashion-MNIST-style images, B=2, C=1, H=W=28 -> flattened K=784.
    # TODO(synk): at B=2 the pallas_call is launch-overhead dominated; the
    # kernel only pays off at batch sizes in the thousands.
    B = 2
    x = jax.random.normal(k_x, (B, 1, 28, 28), dtype=jnp.float32)

    # Deterministic parameter init, PyTorch nn.Linear(784, 10) shapes:
    # weight (num_outputs, num_inputs), bias (num_outputs,).
    bound = 1.0 / (NUM_INPUTS ** 0.5)
    weight = jax.random.uniform(
        k_w, (NUM_OUTPUTS, NUM_INPUTS), dtype=jnp.float32,
        minval=-bound, maxval=bound)
    bias = jax.random.uniform(
        k_b, (NUM_OUTPUTS,), dtype=jnp.float32,
        minval=-bound, maxval=bound)

    y = linear_net_forward(x, weight, bias)
    y = jax.block_until_ready(y)

    # Reference check in plain JAX (f32 math; loose tolerance covers the
    # intentional in-kernel bf16 quantization of x/W).
    y_ref = x.reshape(B, -1) @ weight.T + bias
    assert y.shape == (B, NUM_OUTPUTS)
    assert jnp.allclose(y, y_ref, atol=2e-2, rtol=2e-2), (
        jnp.max(jnp.abs(y - y_ref)))

    print("KERNEL_OK")
</pallas_src>

<mosaic_0001>
module attributes {stable_mosaic.version = 11 : i64} {
  func.func @linear_kernel(%arg0: i32, %arg1: memref<8x784xf32, #tpu.memory_space<vmem>>, %arg2: memref<784x128xbf16, #tpu.memory_space<vmem>>, %arg3: memref<1x10xf32, #tpu.memory_space<vmem>>, %arg4: memref<8x10xf32, #tpu.memory_space<vmem>>) attributes {dimension_semantics = [#tpu.dimension_semantics<parallel>], iteration_bounds = array<i64: 1>, scalar_prefetch = 0 : i64, scratch_operands = 0 : i64, tpu.core_type = #tpu.core_type<tc>, window_params = [{transform_indices = @transform_0, window_bounds = array<i64: 8, 784>}, {pipeline_mode = #tpu.pipeline_mode<synchronous>, transform_indices = @transform_1, window_bounds = array<i64: 784, 128>}, {pipeline_mode = #tpu.pipeline_mode<synchronous>, transform_indices = @transform_2, window_bounds = array<i64: 1, 10>}, {transform_indices = @transform_3, window_bounds = array<i64: 8, 10>}]} {
    %c0 = arith.constant 0 : index
    %c0_0 = arith.constant 0 : index
    %0 = vector.load %arg1[%c0, %c0_0] : memref<8x784xf32, #tpu.memory_space<vmem>>, vector<8x784xf32>
    %1 = arith.truncf %0 : vector<8x784xf32> to vector<8x784xbf16>
    %c0_1 = arith.constant 0 : index
    %c0_2 = arith.constant 0 : index
    %2 = vector.load %arg2[%c0_1, %c0_2] : memref<784x128xbf16, #tpu.memory_space<vmem>>, vector<784x128xbf16>
    %cst = arith.constant dense<0.000000e+00> : vector<8x128xf32>
    %3 = tpu.matmul %1, %2, %cst {dimension_numbers = #tpu.dot_dimension_numbers<[1], [0], [0], [1], [0, 0, 1, 1], [], []>} : vector<8x784xbf16>, vector<784x128xbf16>, vector<8x128xf32> -> vector<8x128xf32>
    %4 = vector.extract_strided_slice %3 {offsets = [0, 0], sizes = [8, 10], strides = [1, 1]} : vector<8x128xf32> to vector<8x10xf32>
    %c0_3 = arith.constant 0 : index
    %c0_4 = arith.constant 0 : index
    %5 = vector.load %arg3[%c0_3, %c0_4] : memref<1x10xf32, #tpu.memory_space<vmem>>, vector<1x10xf32>
    %6 = vector.broadcast %5 : vector<1x10xf32> to vector<8x10xf32>
    %7 = arith.addf %4, %6 : vector<8x10xf32>
    %c0_5 = arith.constant 0 : index
    %c0_6 = arith.constant 0 : index
    %8 = vector.load %arg4[%c0_5, %c0_6] : memref<8x10xf32, #tpu.memory_space<vmem>>, vector<8x10xf32>
    tpu.vector_store %arg4[%c0_5, %c0_6], %7 {strides = array<i32>} : memref<8x10xf32, #tpu.memory_space<vmem>>, vector<8x10xf32>,
    return
  }
  func.func @transform_0(%arg0: i32) -> (i32, i32) {
    %c0_i32 = arith.constant 0 : i32
    %c0_i32_0 = arith.constant 0 : i32
    return %arg0, %c0_i32 : i32, i32
  }
  func.func @transform_1(%arg0: i32) -> (i32, i32) {
    %c0_i32 = arith.constant 0 : i32
    %c0_i32_0 = arith.constant 0 : i32
    %c0_i32_1 = arith.constant 0 : i32
    return %c0_i32, %c0_i32_0 : i32, i32
  }
  func.func @transform_2(%arg0: i32) -> (i32, i32) {
    %c0_i32 = arith.constant 0 : i32
    %c0_i32_0 = arith.constant 0 : i32
    %c0_i32_1 = arith.constant 0 : i32
    return %c0_i32, %c0_i32_0 : i32, i32
  }
  func.func @transform_3(%arg0: i32) -> (i32, i32) {
    %c0_i32 = arith.constant 0 : i32
    %c0_i32_0 = arith.constant 0 : i32
    return %arg0, %c0_i32 : i32, i32
  }
}

</mosaic_0001>

<bundles_post_ra>
// kernel: tpu_custom_call.1
= control target key start
LH: loop header
LB: loop body
LE: loop exit
PB: predicated region body
PF: predicated region fallthrough
CT: control target
= control target key end

     0   :  { %8 = vsyncpa [#allocation3], 0  ;;  %s1070_s0 = inlined_call_operand.hbm [shape: f32[2,784], index: 0, kind: input, shape index: {}]   ;;  %s1071_s1 = inlined_call_operand.hbm [shape: bf16[784,128], index: 1, kind: input, shape index: {}]   ;;  %s1072_s2 = inlined_call_operand.vmem [shape: f32[1,10], index: 2, kind: input, shape index: {}]   ;;  %s1073_s3 = inlined_call_operand.hbm [shape: f32[2,10], index: 3, kind: output, shape index: {}]  }
   0x1   :  { %9 = vsyncpa [#allocation6], 0 }
   0x2   :  { %10 = vsyncpa [#allocation4], 0 }
   0x3   :  { %15 = vsyncadd [#allocation3], 672  ;;  %s999_s12 = smov [#allocation2]   ;;  %s927_s16 = scalar_lea.hbm %s1070_s0, 224 }
   0x4   :  { %s16_s13 = sshll.u32 %s999_s12, 4  ;;  %p928_p0 = scmp.ne.s32.totalorder %s1070_s0, %s927_s16  ;;  %s17_s13 = int_to_ptr.vmem [resolvable:$true] %s16_s13 }
   0x5   :  { %p931_p1 = scmp.lt.u32.totalorder %s927_s16, %s1070_s0 }
   0x7   :  { %p933_p2 = pnand %p931_p1, %p928_p0 }
   0x9   :  { %936 = shalt.err (!%p933_p2)
}
   0xa   :  { %s937_s21 = scalar_lea.vmem %s17_s13, 224  ;;  %s941_s22 = scalar_lea.vmem %s17_s13, 896 }
   0xb   :  { %p938_p3 = scmp.ne.s32.totalorder %s17_s13, %s937_s21  ;;  %p942_p4 = scmp.lt.s32.totalorder %s17_s13, %s17_s13 }
   0xc   :  { %p943_p5 = scmp.lt.s32.totalorder %s941_s22, %s937_s21 }
   0xe   :  { %p944_p6 = por %p943_p5, %p942_p4 }
  0x10   :  { %p945_p7 = pnand %p944_p6, %p938_p3 }
  0x12   :  { %948 = shalt.err (!%p945_p7)
}
  0x13   :  { %s1000_s23 = smov 224   ;;  %s1001_s24 = smov 14  }
  0x14   :  { %22 = dma.hbm_to_vmem [thread:$0]  %s1070_s0, 224, %s17_s13, [#allocation3], %s1000_s23, %s1000_s23, %s1001_s24  }
  0x15   :  { %s1002_s27 = smov [#allocation5]   ;;  %s949_s4 = scalar_lea.hbm %s1071_s1, 6272 }
  0x16   :  { %s28_s28 = sshll.u32 %s1002_s27, 4  ;;  %p950_p8 = scmp.ne.s32.totalorder %s1071_s1, %s949_s4  ;;  %s29_s28 = int_to_ptr.vmem [resolvable:$true] %s28_s28 }
  0x17   :  { %p953_p9 = scmp.lt.u32.totalorder %s949_s4, %s1071_s1 }
  0x19   :  { %p955_p10 = pnand %p953_p9, %p950_p8 }
  0x1b   :  { %958 = shalt.err (!%p955_p10)
}
  0x1c   :  { %s959_s9 = scalar_lea.vmem %s29_s28, 6272  ;;  %p964_p12 = scmp.lt.s32.totalorder %s29_s28, %s29_s28 }
  0x1d   :  { %p960_p11 = scmp.ne.s32.totalorder %s29_s28, %s959_s9  ;;  %p965_p13 = scmp.lt.s32.totalorder %s959_s9, %s959_s9 }
  0x1f   :  { %p966_p0 = por %p965_p13, %p964_p12 }
  0x21   :  { %p967_p1 = pnand %p966_p0, %p960_p11 }
  0x23   :  { %970 = shalt.err (!%p967_p1)
}
  0x24   :  { %s1003_s0 = smov 64   ;;  %s1004_s10 = smov 4  }
  0x25   :  { %34 = dma.hbm_to_vmem [thread:$0]  %s1071_s1, 6272, %s29_s28, [#allocation6], %s1003_s0, %s1003_s0, %s1004_s10  }
  0x26   :  { %993 = dma.done.wait [#allocation3], 896  }
  0x27   :  { %994 = vsyncadd [#allocation3], 4294966400 }
  0x28   :  { %995 = dma.done.wait [#allocation6], 6272  }
  0x29   :  { %996 = vsyncadd [#allocation6], 4294961024  ;;  %v866_v0 = vld [vmem:[#allocation5 + $0x40] sm:$0xff]   ;;  %v870_v4 = vld [vmem:[#allocation5 + $0x48] sm:$0xff]   ;;  %v1005_v24 = vmov 1983009808   ;;  %v67_v26 = vlaneseq }
  0x2a   :  { %v867_v1 = vld [vmem:[#allocation5 + $0xc0] sm:$0xff]   ;;  %780 = vmatprep.subr.bf16.mxu0 %v866_v0  ;;  %v871_v5 = vld [vmem:[#allocation5 + $0xc8] sm:$0xff]   ;;  %v874_v8 = vld [vmem:[#allocation5 + $0x50] sm:$0xff]   ;;  %v65_v25 = vunpack.c.l.s4 %v1005_v24  ;;  %v1006_v42 = vmov 0.0   ;;  %vm1007_vm0 = vmmov 0   ;;  %vm537_vm1 = vcmask 130048  }
  0x2b   :  { %v868_v2 = vld [vmem:[#allocation5] sm:$0xff]   ;;  %802 = vmatprep.subr.bf16.mxu1 %v867_v1  ;;  %v872_v6 = vld [vmem:[#allocation5 + $0x8] sm:$0xff]   ;;  %v875_v9 = vld [vmem:[#allocation5 + $0xd0] sm:$0xff]   ;;  %v68_v32 = vshrl.u32 %v67_v26, 7  ;;  %vm709_vm2 = vcmask 80896  }
  0x2c   :  { %v869_v3 = vld [vmem:[#allocation5 + $0x80] sm:$0xff]   ;;  %781 = vmatpush3.bf16.msra.mxu0 %v868_v2  ;;  %v873_v7 = vld [vmem:[#allocation5 + $0x88] sm:$0xff]   ;;  %v876_v10 = vld [vmem:[#allocation5 + $0x10] sm:$0xff]   ;;  %v66_v31 = vunpack.c.0.s8 %v65_v25 }
  0x2d   :  { %803 = vmatpush3.bf16.msra.mxu1 %v869_v3  ;;  %782 = vmatprep.subr.bf16.mxu0 %v870_v4  ;;  %v877_v11 = vld [vmem:[#allocation5 + $0x90] sm:$0xff]   ;;  %v878_v12 = vld [vmem:[#allocation5 + $0x58] sm:$0xff]   ;;  %v882_v16 = vld [vmem:[#allocation5 + $0x60] sm:$0xff]  }
  0x2e   :  { %804 = vmatprep.subr.bf16.mxu1 %v871_v5  ;;  %v879_v13 = vld [vmem:[#allocation5 + $0xd8] sm:$0xff]   ;;  %v883_v17 = vld [vmem:[#allocation5 + $0xe0] sm:$0xff]   ;;  %v886_v20 = vld [vmem:[#allocation5 + $0x68] sm:$0xff]   ;;  %v69_v37 = vsub.s32 %v66_v31, %v68_v32 }
  0x2f   :  { %v880_v14 = vld [vmem:[#allocation5 + $0x18] sm:$0xff]   ;;  %v884_v18 = vld [vmem:[#allocation5 + $0x20] sm:$0xff]   ;;  %v887_v21 = vld [vmem:[#allocation5 + $0xe8] sm:$0xff]  }
  0x30   :  { %783 = vmatpush3.bf16.msra.mxu0 %v872_v6  ;;  %v881_v15 = vld [vmem:[#allocation5 + $0x98] sm:$0xff]   ;;  %v885_v19 = vld [vmem:[#allocation5 + $0xa0] sm:$0xff]   ;;  %v888_v22 = vld [vmem:[#allocation5 + $0x28] sm:$0xff]  }
  0x31   :  { %805 = vmatpush3.bf16.msra.mxu1 %v873_v7  ;;  %784 = vmatprep.subr.bf16.mxu0 %v874_v8  ;;  %v889_v23 = vld [vmem:[#allocation5 + $0xa8] sm:$0xff]   ;;  %v890_v27 = vld [vmem:[#allocation5 + $0x70] sm:$0xff]   ;;  %v894_v33 = vld [vmem:[#allocation5 + $0x78] sm:$0xff]  }
  0x32   :  { %806 = vmatprep.subr.bf16.mxu1 %v875_v9  ;;  %v891_v28 = vld [vmem:[#allocation5 + $0xf0] sm:$0xff]   ;;  %v895_v34 = vld [vmem:[#allocation5 + $0xf8] sm:$0xff]   ;;  %v904_v45 = vld [vmem:[#allocation5 + $0x140] sm:$0xff]  }
  0x33   :  { %v892_v29 = vld [vmem:[#allocation5 + $0x30] sm:$0xff]   ;;  %v896_v35 = vld [vmem:[#allocation5 + $0x38] sm:$0xff]   ;;  %v905_v54 = vld [vmem:[#allocation5 + $0x100] sm:$0xff]  }
  0x34   :  { %785 = vmatpush3.bf16.msra.mxu0 %v876_v10  ;;  %v893_v30 = vld [vmem:[#allocation5 + $0xb0] sm:$0xff]   ;;  %v897_v36 = vld [vmem:[#allocation5 + $0xb8] sm:$0xff]   ;;  %v906_v57 = vld [vmem:[#allocation5 + $0x148] sm:$0xff]  }
  0x35   :  { %807 = vmatpush3.bf16.msra.mxu1 %v877_v11  ;;  %786 = vmatprep.subr.bf16.mxu0 %v878_v12  ;;  %v898_v38 = vld [vmem:[#allocation2] ss:$14 sps:$4 sm:$0xff]   ;;  %v900_v39 = vld [vmem:[#allocation2 + $0x1c] ss:$14 sps:$4 sm:$0xff]   ;;  %v902_v40 = vld [vmem:[#allocation2 + $0x4] ss:$14 sps:$4 sm:$0xff]  }
  0x36   :  { %808 = vmatprep.subr.bf16.mxu1 %v879_v13  ;;  %v903_v41 = vld [vmem:[#allocation2 + $0x20] ss:$14 sps:$4 sm:$0xff]   ;;  %v70_v43 = vrot.slane %v898_v38, %v69_v37  ;;  %v84_v44 = vrot.slane %v900_v39, %v69_v37  ;;  %v77_v46 = vrot.slane %v902_v40, %v69_v37  ;;  %v912_v63 = vld [vmem:[#allocation5 + $0x160] sm:$0xff]   ;;  %v924_v3 = vld [vmem:[#allocation2 + $0x24] ss:$14 sps:$4 sm:$0xff]  }
  0x37   :  { %v91_v47 = vrot.slane %v903_v41, %v69_v37  ;;  %v907_v58 = vld [vmem:[#allocation5 + $0x108] sm:$0xff]   ;;  %v908_v59 = vld [vmem:[#allocation5 + $0x150] sm:$0xff]   ;;  %v910_v61 = vld [vmem:[#allocation5 + $0x158] sm:$0xff]   ;;  %v120_v9 = vrot.slane %v924_v3, %v69_v37 }
  0x38   :  { %787 = vmatpush3.bf16.msra.mxu0 %v880_v14  ;;  %v93_v48 = vcombine.high %v70_v43, %v84_v44  ;;  %v92_v49 = vcombine.low %v70_v43, %v84_v44  ;;  %v909_v60 = vld [vmem:[#allocation5 + $0x110] sm:$0xff]   ;;  %v911_v62 = vld [vmem:[#allocation5 + $0x118] sm:$0xff]   ;;  %v920_v0 = vld [vmem:[#allocation5 + $0x180] sm:$0xff]  }
  0x39   :  { %809 = vmatpush3.bf16.msra.mxu1 %v881_v15  ;;  %788 = vmatprep.subr.bf16.mxu0 %v882_v16  ;;  %v95_v50 = vcombine.high %v77_v46, %v91_v47  ;;  %v94_v51 = vcombine.low %v77_v46, %v91_v47  ;;  %v921_v1 = vld [vmem:[#allocation2 + $0x8] ss:$14 sps:$4 sm:$0xff]   ;;  %v923_v2 = vld [vmem:[#allocation2 + $0xc] ss:$14 sps:$4 sm:$0x33]   ;;  %v914_v8 = vld [vmem:[#allocation5 + $0x168] sm:$0xff]  }
  0x3a   :  { %810 = vmatprep.subr.bf16.mxu1 %v883_v17  ;;  %v139_v52 = vpack.c.bf16 %v93_v48, %v93_v48  ;;  %v138_v53 = vpack.c.bf16 %v92_v49, %v92_v49  ;;  %v926_v4 = vld [vmem:[#allocation2 + $0x28] ss:$14 sps:$4 sm:$0x33]   ;;  %v913_v5 = vld [vmem:[#allocation5 + $0x120] sm:$0xff]   ;;  %v106_v6 = vrot.slane %v921_v1, %v69_v37  ;;  %v113_v7 = vrot.slane %v923_v2, %v69_v37  ;;  %v915_v13 = vld [vmem:[#allocation5 + $0x128] sm:$0xff]  }
  0x3b   :  { %v141_v55 = vpack.c.bf16 %v95_v50, %v95_v50  ;;  %v140_v56 = vpack.c.bf16 %v94_v51, %v94_v51  ;;  %v127_v10 = vrot.slane %v926_v4, %v69_v37  ;;  %v916_v14 = vld [vmem:[#allocation5 + $0x170] sm:$0xff]   ;;  %v779_v43 = vld [vmem:[%s1072_s2] ss:$0 sm:$0xff] }
  0x3c   :  { %789 = vmatpush3.bf16.msra.mxu0 %v884_v18  ;;  %573 = vmatprep.mubr.bf16.mxu0 %v139_v52  ;;  %v129_v11 = vcombine.high %v106_v6, %v120_v9  ;;  %v917_v17 = vld [vmem:[#allocation5 + $0x130] sm:$0xff]   ;;  %v918_v18 = vld [vmem:[#allocation5 + $0x178] sm:$0xff]  }
  0x3d   :  { %811 = vmatpush3.bf16.msra.mxu1 %v885_v19  ;;  %790 = vmatprep.subr.bf16.mxu0 %v886_v20  ;;  %v130_v12 = vcombine.low %v113_v7, %v127_v10  ;;  %v128_v19 = vcombine.low %v106_v6, %v120_v9  ;;  %v919_v20 = vld [vmem:[#allocation5 + $0x138] sm:$0xff]  }
  0x3e   :  { %812 = vmatprep.subr.bf16.mxu1 %v887_v21  ;;  %613 = vmatprep.mubr.bf16.mxu1 %v141_v55  ;;  %v143_v15 = vpack.c.bf16 %v129_v11, %v129_v11 }
  0x3f   :  { %v144_v16 = vpack.c.bf16 %v130_v12, %v130_v12  ;;  %v142_v21 = vpack.c.bf16 %v128_v19, %v128_v19 }
  0x40   :  { %791 = vmatpush3.bf16.msra.mxu0 %v888_v22 }
  0x41   :  { %813 = vmatpush3.bf16.msra.mxu1 %v889_v23  ;;  %792 = vmatprep.subr.bf16.mxu0 %v890_v27 }
  0x42   :  { %814 = vmatprep.subr.bf16.mxu1 %v891_v28 }
  0x44   :  { %793 = vmatpush3.bf16.msra.mxu0 %v892_v29 }
  0x45   :  { %815 = vmatpush3.bf16.msra.mxu1 %v893_v30  ;;  %794 = vmatprep.subr.bf16.mxu0 %v894_v33 }
  0x46   :  { %816 = vmatprep.subr.bf16.mxu1 %v895_v34 }
  0x48   :  { %795 = vmatpush3.bf16.msra.mxu0 %v896_v35 }
  0x49   :  { %817 = vmatpush3.bf16.msra.mxu1 %v897_v36  ;;  %824 = vmatprep.subr.bf16.mxu0 %v904_v45 }
  0x4a   :  { %848 = vmatprep.subr.bf16.mxu1 %v1006_v42 }
  0x4b   :  { %574 = vmatmul.mubr.bf16.vlgmr.msra.gmra.mrb[0].mxu0 %v138_v53 }
  0x4c   :  { %614 = vmatmul.mubr.bf16.vlgmr.msra.gmra.mrb[0].mxu1 %v140_v56  ;;  %825 = vmatpush3.bf16.msra.mxu0 %v905_v54 }
  0x4d   :  { %826 = vmatprep.subr.bf16.mxu0 %v906_v57  ;;  %850 = vmatprep.mubr.msk.bf16.mxu1 %vm1007_vm0, %v1006_v42 }
  0x4e   :  { %849 = vmatpush3.bf16.msra.mxu1 %v920_v0  ;;  %653 = vmatprep.mubr.bf16.mxu0 %v143_v15 }
  0x50   :  { %827 = vmatpush3.bf16.msra.mxu0 %v907_v58 }
  0x51   :  { %828 = vmatprep.subr.bf16.mxu0 %v908_v59 }
  0x54   :  { %829 = vmatpush3.bf16.msra.mxu0 %v909_v60  ;;  %851 = vmatmul.mubr.msk.bf16.vlgmr.msra.gmra.mrb[4].mxu1 %vm537_vm1, %v144_v16 }
  0x55   :  { %830 = vmatprep.subr.bf16.mxu0 %v910_v61 }
  0x58   :  { %831 = vmatpush3.bf16.msra.mxu0 %v911_v62 }
  0x59   :  { %832 = vmatprep.subr.bf16.mxu0 %v912_v63 }
  0x5c   :  { %833 = vmatpush3.bf16.msra.mxu0 %v913_v5 }
  0x5d   :  { %834 = vmatprep.subr.bf16.mxu0 %v914_v8 }
  0x60   :  { %835 = vmatpush3.bf16.msra.mxu0 %v915_v13 }
  0x61   :  { %836 = vmatprep.subr.bf16.mxu0 %v916_v14 }
  0x64   :  { %837 = vmatpush3.bf16.msra.mxu0 %v917_v17 }
  0x65   :  { %838 = vmatprep.subr.bf16.mxu0 %v918_v18 }
  0x68   :  { %839 = vmatpush3.bf16.msra.mxu0 %v919_v20 }
  0x6b   :  { %654 = vmatmul.mubr.bf16.vlgmr.msra.gmra.mrb[4].mxu0 %v142_v21 }
 0x11e   :  { %v796_v22 = vpop.f32.mrb[0].mxu0 }
 0x11f   :  { %v818_v23 = vpop.f32.mrb[0].mxu1  ;;  %v797_v24 = vpop.f32.mrb[1].mxu0 }
 0x120   :  { %v798_v25 = vadd.f32 %v797_v24, %v796_v22  ;;  %v819_v26 = vpop.f32.mrb[1].mxu1  ;;  %v799_v27 = vpop.f32.mrb[2].mxu0 }
 0x121   :  { %v820_v28 = vadd.f32 %v819_v26, %v818_v23  ;;  %v800_v29 = vpop.f32.mrb[3].mxu0  ;;  %v821_v30 = vpop.f32.mrb[2].mxu1 }
 0x122   :  { %v822_v31 = vpop.f32.mrb[3].mxu1 }
 0x123   :  { %v616_v32 = vadd.f32 %v820_v28, %v798_v25 }
 0x127   :  { %v695_v33 = vpop.f32.mrb[4].mxu1 }
 0x128   :  { %v852_v34 = vpop.f32.mrb[5].mxu1 }
 0x129   :  { %v698_v35 = vpop.f32.mrb[6].mxu1 }
 0x12a   :  { %v853_v36 = vpop.f32.mrb[7].mxu1 }
 0x13e   :  { %v840_v37 = vpop.f32.mrb[4].mxu0 }
 0x13f   :  { %v841_v38 = vpop.f32.mrb[5].mxu0 }
 0x140   :  { %v842_v39 = vadd.f32 %v841_v38, %v840_v37  ;;  %v843_v40 = vpop.f32.mrb[6].mxu0 }
 0x141   :  { %v844_v41 = vpop.f32.mrb[7].mxu0 }
 0x142   :  { %v656_v42 = vadd.f32 %v842_v39, %v616_v32 }
 0x144   :  { %v696_v44 = vadd.f32 %v695_v33, %v656_v42 }
 0x146   :  { %v708_v45 = vadd.f32 %v779_v43, %v696_v44 }
 0x148   :  { %710 = vst.msk [vmem:[#allocation7] sm:$0xff] %vm709_vm2, %v708_v45 }
 0x149   :  { %715 = vsyncadd [#allocation4], 96  ;;  %s1008_s14 = smov [#allocation7]  }
 0x14a   :  { %s716_s15 = sshll.u32 %s1008_s14, 4  ;;  %s717_s15 = int_to_ptr.vmem [resolvable:$true] %s716_s15 }
 0x14b   :  { %s971_s16 = scalar_lea.vmem %s717_s15, 32  ;;  %s975_s17 = scalar_lea.vmem %s717_s15, 128 }
 0x14c   :  { %p972_p2 = scmp.ne.s32.totalorder %s717_s15, %s971_s16  ;;  %p976_p3 = scmp.lt.s32.totalorder %s717_s15, %s717_s15 }
 0x14d   :  { %p977_p4 = scmp.lt.s32.totalorder %s975_s17, %s971_s16 }
 0x14f   :  { %p978_p5 = por %p977_p4, %p976_p3 }
 0x151   :  { %p979_p6 = pnand %p978_p5, %p972_p2 }
 0x153   :  { %982 = shalt.err (!%p979_p6)
}
 0x154   :  { %s983_s2 = scalar_lea.hbm %s1073_s3, 32 }
 0x155   :  { %p984_p7 = scmp.ne.s32.totalorder %s1073_s3, %s983_s2  ;;  %p987_p8 = scmp.lt.u32.totalorder %s983_s2, %s1073_s3 }
 0x157   :  { %p989_p9 = pnand %p987_p8, %p984_p7 }
 0x159   :  { %992 = shalt.err (!%p989_p9)
}
 0x15a   :  { %s1009_s24 = smov 32   ;;  %s1010_s25 = smov 2  }
 0x15b   :  { %722 = dma.vmem_to_hbm [thread:$0]  %s717_s15, 32, %s1073_s3, [#allocation4], %s1009_s24, %s1009_s24, %s1010_s25  }
 0x15c   :  { %997 = dma.done.wait [#allocation4], 128  }
 0x15d   :  { %998 = vsyncadd [#allocation4], 4294967168 }
 0x15e   :  { %726 = vsyncpa [#allocation3], 1 }
 0x15f   :  { %727 = vsyncpa [#allocation6], 1 }
 0x160   :  { %728 = vsyncpa [#allocation4], 1 }

</bundles_post_ra>
